<compile_context>
chip_gen: v7x
topology: tpu7x:2x2x1
jax: 0.10.0
libtpu: 0.0.40
codegen_flags: <defaults>
</compile_context>

<pallas_src>
import functools

import jax
import jax.numpy as jnp
from jax.experimental import pallas as pl
from jax.experimental.pallas import tpu as pltpu


def _round_up(n: int, m: int) -> int:
    return ((n + m - 1) // m) * m


def _mlp_kernel(x_ref, w1_ref, b1_ref, w2_ref, b2_ref, w3_ref, b3_ref, o_ref):
    # fc1 + ReLU   (x, w1 already in compute dtype; accumulate in f32)
    h1 = jnp.dot(x_ref[...], w1_ref[...], preferred_element_type=jnp.float32)
    h1 = jnp.maximum(h1 + b1_ref[...], 0.0)
    # fc2 + ReLU
    h2 = jnp.dot(h1.astype(w2_ref.dtype), w2_ref[...],
                 preferred_element_type=jnp.float32)
    h2 = jnp.maximum(h2 + b2_ref[...], 0.0)
    # fc3 (logits, no activation) -> lane-dense (padded to 128) output store
    out = jnp.dot(h2.astype(w3_ref.dtype), w3_ref[...],
                  preferred_element_type=jnp.float32)
    o_ref[...] = (out + b3_ref[...]).astype(o_ref.dtype)


@functools.partial(jax.jit, static_argnames=("block_batch", "compute_dtype"))
def simple_nn_forward(x, params, *, block_batch: int = 2048,
                      compute_dtype=jnp.bfloat16):
    """x: (B, input_size) float32. params: dict of w1,b1,w2,b2,w3,b3 (weights (in,out))."""
    w1, b1 = params["w1"], params["b1"]
    w2, b2 = params["w2"], params["b2"]
    w3, b3 = params["w3"], params["b3"]

    B, in_size = x.shape
    h1_dim = w1.shape[1]
    h2_dim = w2.shape[1]
    num_classes = w3.shape[1]

    # Pad the last layer's output dim to a multiple of 128 so the final store is
    # lane-dense (no masked partial stores). Zero-padding keeps the math identical;
    # the wrapper slices the result back to num_classes.
    n_pad = _round_up(num_classes, 128)
    w3p = jnp.zeros((h2_dim, n_pad), w3.dtype).at[:, :num_classes].set(w3)
    b3p = jnp.zeros((1, n_pad), b3.dtype).at[:, :num_classes].set(b3)

    # bf16 MXU inputs (f32 accumulation stays inside the kernel); biases stay f32.
    w1c = w1.astype(compute_dtype)
    w2c = w2.astype(compute_dtype)
    w3c = w3p.astype(compute_dtype)

    # Pad the batch to a multiple of 8 so the (sublane) block constraint always
    # holds regardless of B; padded rows are sliced off after the call.
    B_pad = _round_up(B, 8)
    xc = x.astype(compute_dtype)
    if B_pad != B:
        xc = jnp.zeros((B_pad, in_size), compute_dtype).at[:B, :].set(xc)

    # Batch tile: large to amortize per-step overhead, clamped for small B.
    tb = min(block_batch, B_pad)
    grid = (pl.cdiv(B_pad, tb),)

    bpe_in = jnp.dtype(compute_dtype).itemsize
    weight_bytes = (w1c.size + w2c.size + w3c.size) * bpe_in \
        + (b1.size + b2.size + b3p.size) * 4
    cost = pl.CostEstimate(
        flops=2 * B_pad * (in_size * h1_dim + h1_dim * h2_dim + h2_dim * n_pad),
        transcendentals=0,
        bytes_accessed=B_pad * in_size * bpe_in + B_pad * n_pad * 4 + weight_bytes,
    )

    out_padded = pl.pallas_call(
        _mlp_kernel,
        out_shape=jax.ShapeDtypeStruct((B_pad, n_pad), jnp.float32),
        grid=grid,
        in_specs=[
            pl.BlockSpec((tb, in_size), lambda i: (i, 0)),          # x tile
            pl.BlockSpec(w1c.shape, lambda i: (0, 0)),              # w1 (resident)
            pl.BlockSpec(b1.shape, lambda i: (0, 0)),               # b1 (resident)
            pl.BlockSpec(w2c.shape, lambda i: (0, 0)),              # w2 (resident)
            pl.BlockSpec(b2.shape, lambda i: (0, 0)),               # b2 (resident)
            pl.BlockSpec(w3c.shape, lambda i: (0, 0)),              # w3 (padded, resident)
            pl.BlockSpec(b3p.shape, lambda i: (0, 0)),              # b3 (padded, resident)
        ],
        out_specs=pl.BlockSpec((tb, n_pad), lambda i: (i, 0)),
        compiler_params=pltpu.CompilerParams(
            dimension_semantics=("parallel",),
        ),
        cost_estimate=cost,
    )(xc, w1c, b1, w2c, b2, w3c, b3p)

    return out_padded[:B, :num_classes]


def init_params(key, input_size, num_classes):
    """Deterministic init mimicking nn.Linear's U(-1/sqrt(fan_in), 1/sqrt(fan_in)).
    Weights stored as (in, out) = transpose of PyTorch's (out, in)."""
    ks = jax.random.split(key, 6)

    def linear(kw, kb, fan_in, fan_out):
        bound = 1.0 / jnp.sqrt(jnp.float32(fan_in))
        w = jax.random.uniform(kw, (fan_in, fan_out), jnp.float32, -bound, bound)
        b = jax.random.uniform(kb, (1, fan_out), jnp.float32, -bound, bound)
        return w, b

    w1, b1 = linear(ks[0], ks[1], input_size, 64)
    w2, b2 = linear(ks[2], ks[3], 64, 32)
    w3, b3 = linear(ks[4], ks[5], 32, num_classes)
    return {"w1": w1, "b1": b1, "w2": w2, "b2": b2, "w3": w3, "b3": b3}


def _reference(x, params, compute_dtype=jnp.bfloat16):
    """Pure-JAX reference using the same bf16-in / f32-accumulate math."""
    w1, b1 = params["w1"], params["b1"]
    w2, b2 = params["w2"], params["b2"]
    w3, b3 = params["w3"], params["b3"]
    h1 = jnp.dot(x.astype(compute_dtype), w1.astype(compute_dtype),
                 preferred_element_type=jnp.float32) + b1
    h1 = jnp.maximum(h1, 0.0)
    h2 = jnp.dot(h1.astype(compute_dtype), w2.astype(compute_dtype),
                 preferred_element_type=jnp.float32) + b2
    h2 = jnp.maximum(h2, 0.0)
    return jnp.dot(h2.astype(compute_dtype), w3.astype(compute_dtype),
                   preferred_element_type=jnp.float32) + b3


if __name__ == "__main__":
    key = jax.random.PRNGKey(0)
    k_x, k_p = jax.random.split(key)

    batch = 8          # tabular mini-batch (small demo shape)
    input_size = 16    # tabular feature count
    num_classes = 4

    x = jax.random.normal(k_x, (batch, input_size), dtype=jnp.float32)
    params = init_params(k_p, input_size, num_classes)

    out = simple_nn_forward(x, params)
    out = jax.block_until_ready(out)

    ref = _reference(x, params)
    assert out.shape == (batch, num_classes)
    assert jnp.allclose(out, ref, atol=2e-2, rtol=2e-2), (
        f"max abs err {jnp.max(jnp.abs(out - ref))}")

    print("KERNEL_OK")
</pallas_src>

<mosaic_0001>
module attributes {stable_mosaic.version = 11 : i64} {
  func.func @_mlp_kernel(%arg0: i32, %arg1: memref<8x16xbf16, #tpu.memory_space<vmem>>, %arg2: memref<16x64xbf16, #tpu.memory_space<vmem>>, %arg3: memref<1x64xf32, #tpu.memory_space<vmem>>, %arg4: memref<64x32xbf16, #tpu.memory_space<vmem>>, %arg5: memref<1x32xf32, #tpu.memory_space<vmem>>, %arg6: memref<32x128xbf16, #tpu.memory_space<vmem>>, %arg7: memref<1x128xf32, #tpu.memory_space<vmem>>, %arg8: memref<8x128xf32, #tpu.memory_space<vmem>>) attributes {dimension_semantics = [#tpu.dimension_semantics<parallel>], iteration_bounds = array<i64: 1>, scalar_prefetch = 0 : i64, scratch_operands = 0 : i64, tpu.core_type = #tpu.core_type<tc>, window_params = [{transform_indices = @transform_0, window_bounds = array<i64: 8, 16>}, {pipeline_mode = #tpu.pipeline_mode<synchronous>, transform_indices = @transform_1, window_bounds = array<i64: 16, 64>}, {pipeline_mode = #tpu.pipeline_mode<synchronous>, transform_indices = @transform_2, window_bounds = array<i64: 1, 64>}, {pipeline_mode = #tpu.pipeline_mode<synchronous>, transform_indices = @transform_3, window_bounds = array<i64: 64, 32>}, {pipeline_mode = #tpu.pipeline_mode<synchronous>, transform_indices = @transform_4, window_bounds = array<i64: 1, 32>}, {pipeline_mode = #tpu.pipeline_mode<synchronous>, transform_indices = @transform_5, window_bounds = array<i64: 32, 128>}, {pipeline_mode = #tpu.pipeline_mode<synchronous>, transform_indices = @transform_6, window_bounds = array<i64: 1, 128>}, {transform_indices = @transform_7, window_bounds = array<i64: 8, 128>}]} {
    %c0 = arith.constant 0 : index
    %c0_0 = arith.constant 0 : index
    %0 = vector.load %arg1[%c0, %c0_0] : memref<8x16xbf16, #tpu.memory_space<vmem>>, vector<8x16xbf16>
    %c0_1 = arith.constant 0 : index
    %c0_2 = arith.constant 0 : index
    %1 = vector.load %arg2[%c0_1, %c0_2] : memref<16x64xbf16, #tpu.memory_space<vmem>>, vector<16x64xbf16>
    %cst = arith.constant dense<0.000000e+00> : vector<8x64xf32>
    %2 = tpu.matmul %0, %1, %cst {dimension_numbers = #tpu.dot_dimension_numbers<[1], [0], [0], [1], [0, 0, 1, 1], [], []>} : vector<8x16xbf16>, vector<16x64xbf16>, vector<8x64xf32> -> vector<8x64xf32>
    %c0_3 = arith.constant 0 : index
    %c0_4 = arith.constant 0 : index
    %3 = vector.load %arg3[%c0_3, %c0_4] : memref<1x64xf32, #tpu.memory_space<vmem>>, vector<1x64xf32>
    %4 = vector.broadcast %3 : vector<1x64xf32> to vector<8x64xf32>
    %5 = arith.addf %2, %4 : vector<8x64xf32>
    %cst_5 = arith.constant 0.000000e+00 : f32
    %6 = vector.broadcast %cst_5 : f32 to vector<8x64xf32>
    %7 = arith.maximumf %5, %6 : vector<8x64xf32>
    %8 = arith.truncf %7 : vector<8x64xf32> to vector<8x64xbf16>
    %c0_6 = arith.constant 0 : index
    %c0_7 = arith.constant 0 : index
    %9 = vector.load %arg4[%c0_6, %c0_7] : memref<64x32xbf16, #tpu.memory_space<vmem>>, vector<64x32xbf16>
    %cst_8 = arith.constant dense<0.000000e+00> : vector<8x32xf32>
    %10 = tpu.matmul %8, %9, %cst_8 {dimension_numbers = #tpu.dot_dimension_numbers<[1], [0], [0], [1], [0, 0, 1, 1], [], []>} : vector<8x64xbf16>, vector<64x32xbf16>, vector<8x32xf32> -> vector<8x32xf32>
    %c0_9 = arith.constant 0 : index
    %c0_10 = arith.constant 0 : index
    %11 = vector.load %arg5[%c0_9, %c0_10] : memref<1x32xf32, #tpu.memory_space<vmem>>, vector<1x32xf32>
    %12 = vector.broadcast %11 : vector<1x32xf32> to vector<8x32xf32>
    %13 = arith.addf %10, %12 : vector<8x32xf32>
    %cst_11 = arith.constant 0.000000e+00 : f32
    %14 = vector.broadcast %cst_11 : f32 to vector<8x32xf32>
    %15 = arith.maximumf %13, %14 : vector<8x32xf32>
    %16 = arith.truncf %15 : vector<8x32xf32> to vector<8x32xbf16>
    %c0_12 = arith.constant 0 : index
    %c0_13 = arith.constant 0 : index
    %17 = vector.load %arg6[%c0_12, %c0_13] : memref<32x128xbf16, #tpu.memory_space<vmem>>, vector<32x128xbf16>
    %cst_14 = arith.constant dense<0.000000e+00> : vector<8x128xf32>
    %18 = tpu.matmul %16, %17, %cst_14 {dimension_numbers = #tpu.dot_dimension_numbers<[1], [0], [0], [1], [0, 0, 1, 1], [], []>} : vector<8x32xbf16>, vector<32x128xbf16>, vector<8x128xf32> -> vector<8x128xf32>
    %c0_15 = arith.constant 0 : index
    %c0_16 = arith.constant 0 : index
    %19 = vector.load %arg7[%c0_15, %c0_16] : memref<1x128xf32, #tpu.memory_space<vmem>>, vector<1x128xf32>
    %20 = vector.broadcast %19 : vector<1x128xf32> to vector<8x128xf32>
    %21 = arith.addf %18, %20 : vector<8x128xf32>
    %c0_17 = arith.constant 0 : index
    %c0_18 = arith.constant 0 : index
    %22 = vector.load %arg8[%c0_17, %c0_18] : memref<8x128xf32, #tpu.memory_space<vmem>>, vector<8x128xf32>
    tpu.vector_store %arg8[%c0_17, %c0_18], %21 {strides = array<i32>} : memref<8x128xf32, #tpu.memory_space<vmem>>, vector<8x128xf32>,
    return
  }
  func.func @transform_0(%arg0: i32) -> (i32, i32) {
    %c0_i32 = arith.constant 0 : i32
    %c0_i32_0 = arith.constant 0 : i32
    return %arg0, %c0_i32 : i32, i32
  }
  func.func @transform_1(%arg0: i32) -> (i32, i32) {
    %c0_i32 = arith.constant 0 : i32
    %c0_i32_0 = arith.constant 0 : i32
    %c0_i32_1 = arith.constant 0 : i32
    return %c0_i32, %c0_i32_0 : i32, i32
  }
  func.func @transform_2(%arg0: i32) -> (i32, i32) {
    %c0_i32 = arith.constant 0 : i32
    %c0_i32_0 = arith.constant 0 : i32
    %c0_i32_1 = arith.constant 0 : i32
    return %c0_i32, %c0_i32_0 : i32, i32
  }
  func.func @transform_3(%arg0: i32) -> (i32, i32) {
    %c0_i32 = arith.constant 0 : i32
    %c0_i32_0 = arith.constant 0 : i32
    %c0_i32_1 = arith.constant 0 : i32
    return %c0_i32, %c0_i32_0 : i32, i32
  }
  func.func @transform_4(%arg0: i32) -> (i32, i32) {
    %c0_i32 = arith.constant 0 : i32
    %c0_i32_0 = arith.constant 0 : i32
    %c0_i32_1 = arith.constant 0 : i32
    return %c0_i32, %c0_i32_0 : i32, i32
  }
  func.func @transform_5(%arg0: i32) -> (i32, i32) {
    %c0_i32 = arith.constant 0 : i32
    %c0_i32_0 = arith.constant 0 : i32
    %c0_i32_1 = arith.constant 0 : i32
    return %c0_i32, %c0_i32_0 : i32, i32
  }
  func.func @transform_6(%arg0: i32) -> (i32, i32) {
    %c0_i32 = arith.constant 0 : i32
    %c0_i32_0 = arith.constant 0 : i32
    %c0_i32_1 = arith.constant 0 : i32
    return %c0_i32, %c0_i32_0 : i32, i32
  }
  func.func @transform_7(%arg0: i32) -> (i32, i32) {
    %c0_i32 = arith.constant 0 : i32
    %c0_i32_0 = arith.constant 0 : i32
    return %arg0, %c0_i32 : i32, i32
  }
}

</mosaic_0001>

<bundles_post_ra>
// kernel: simple_nn_forward.1
= control target key start
LH: loop header
LB: loop body
LE: loop exit
PB: predicated region body
PF: predicated region fallthrough
CT: control target
= control target key end

     0   :  { %v304_v0 = vmov 0.0   ;;  %vm305_vm0 = vmmov 0   ;;  %vm43_vm1 = vcmask 130048   ;;  %vm128_vm2 = vcmask 523264   ;;  %s382_s1 = inlined_call_operand.vmem [shape: bf16[16,64], index: 1, kind: input, shape index: {}]   ;;  %s383_s0 = inlined_call_operand.vmem [shape: bf16[8,16], index: 0, kind: input, shape index: {}]   ;;  %s384_s3 = inlined_call_operand.vmem [shape: bf16[64,32], index: 3, kind: input, shape index: {}]   ;;  %s385_s5 = inlined_call_operand.vmem [shape: bf16[32,128], index: 5, kind: input, shape index: {}]   ;;  %s386_s2 = inlined_call_operand.vmem [shape: f32[1,64], index: 2, kind: input, shape index: {}]   ;;  %s387_s4 = inlined_call_operand.vmem [shape: f32[1,32], index: 4, kind: input, shape index: {}]   ;;  %s388_s6 = inlined_call_operand.vmem [shape: f32[1,128], index: 6, kind: input, shape index: {}]   ;;  %s389_s7 = inlined_call_operand.vmem [shape: f32[8,128], index: 7, kind: output, shape index: {}]  }
   0x1   :  { %269 = vmatprep.subr.bf16.mxu0 %v304_v0  ;;  %v297_v1 = vld [vmem:[%s382_s1] sm:$0xff]   ;;  %271 = vmatprep.mubr.msk.bf16.mxu0 %vm305_vm0, %v304_v0  ;;  %v299_v4 = vld [vmem:[%s384_s3 + $0x8] sm:$0xff]   ;;  %v300_v5 = vld [vmem:[%s384_s3 + $0x10] sm:$0xff]   ;;  %vm197_vm3 = vcmask 261120  }
   0x2   :  { %v27_v2 = vld [vmem:[%s383_s0] sm:$0xf]  ;;  %275 = vmatprep.subr.bf16.mxu1 %v304_v0  ;;  %283 = vmatprep.mubr.msk.bf16.mxu1 %vm305_vm0, %v304_v0  ;;  %v301_v6 = vld [vmem:[%s384_s3 + $0x18] sm:$0xff]   ;;  %v303_v16 = vld [vmem:[%s385_s5 + $0x8] sm:$0xff]  }
   0x3   :  { %270 = vmatpush3.bf16.msra.mxu0 %v297_v1  ;;  %v298_v3 = vld [vmem:[%s384_s3] sm:$0xff]  }
   0x4   :  { %287 = vmatprep.subr.bf16.mxu0 %v304_v0  ;;  %276 = vmatpush3.bf16.msra.mxu1 %v298_v3  ;;  %v302_v7 = vld [vmem:[%s385_s5] sm:$0xff]  }
   0x5   :  { %277 = vmatprep.subr.bf16.mxu1 %v304_v0  ;;  %v246_v8 = vld [vmem:[%s386_s2] ss:$0 sm:$0xff] }
   0x6   :  { %272 = vmatmul.mubr.msk.bf16.vlgmr.msra.gmra.mrb[0].mxu0 %vm43_vm1, %v27_v2  ;;  %v249_v17 = vld [vmem:[%s387_s4] ss:$0 sm:$0xff] }
   0x7   :  { %291 = vmatprep.mubr.msk.bf16.mxu0 %vm305_vm0, %v304_v0  ;;  %288 = vmatpush3.bf16.msra.mxu0 %v302_v7  ;;  %v255_v25 = vld [vmem:[%s388_s6] ss:$0 sm:$0xff] }
   0x8   :  { %278 = vmatpush3.bf16.msra.mxu1 %v299_v4  ;;  %289 = vmatprep.subr.bf16.mxu0 %v304_v0 }
   0x9   :  { %279 = vmatprep.subr.bf16.mxu1 %v304_v0 }
   0xb   :  { %290 = vmatpush3.bf16.msra.mxu0 %v303_v16 }
   0xc   :  { %280 = vmatpush3.bf16.msra.mxu1 %v300_v5 }
   0xd   :  { %281 = vmatprep.subr.bf16.mxu1 %v304_v0 }
  0x10   :  { %282 = vmatpush3.bf16.msra.mxu1 %v301_v6 }
  0xd9   :  { %v81_v9 = vpop.f32.mrb[0].mxu0 }
  0xda   :  { %v82_v10 = vadd.f32 %v246_v8, %v81_v9  ;;  %v273_v11 = vpop.f32.mrb[1].mxu0 }
  0xdb   :  { %v84_v12 = vpop.f32.mrb[2].mxu0 }
  0xdc   :  { %v87_v13 = vmax.f32 %v82_v10, 0.0  ;;  %v274_v14 = vpop.f32.mrb[3].mxu0 }
  0xde   :  { %v88_v15 = vpack.c.bf16 %v87_v13, %v87_v13 }
  0xe0   :  { %284 = vmatmul.mubr.msk.bf16.vlgmr.msra.gmra.mrb[0].mxu1 %vm128_vm2, %v88_v15 }
 0x1b3   :  { %v166_v18 = vpop.f32.mrb[0].mxu1 }
 0x1b4   :  { %v167_v19 = vadd.f32 %v249_v17, %v166_v18  ;;  %v285_v20 = vpop.f32.mrb[1].mxu1 }
 0x1b5   :  { %v169_v21 = vpop.f32.mrb[2].mxu1 }
 0x1b6   :  { %v172_v22 = vmax.f32 %v167_v19, 0.0  ;;  %v286_v23 = vpop.f32.mrb[3].mxu1 }
 0x1b8   :  { %v173_v24 = vpack.c.bf16 %v172_v22, %v172_v22 }
 0x1ba   :  { %292 = vmatmul.mubr.msk.bf16.vlgmr.msra.gmra.mrb[4].mxu0 %vm197_vm3, %v173_v24 }
 0x28d   :  { %v235_v26 = vpop.f32.mrb[4].mxu0 }
 0x28e   :  { %v236_v27 = vadd.f32 %v255_v25, %v235_v26  ;;  %v293_v28 = vpop.f32.mrb[5].mxu0 }
 0x28f   :  { %v238_v29 = vpop.f32.mrb[6].mxu0 }
 0x290   :  { %241 = vst [vmem:[%s389_s7] sm:$0xff] %v236_v27  ;;  %v294_v30 = vpop.f32.mrb[7].mxu0 }

</bundles_post_ra>
